<compile_context>
chip_gen: v7x
topology: tpu7x:2x2x1
jax: 0.10.0
libtpu: 0.0.40
codegen_flags: <defaults>
</compile_context>

<pallas_src>
import functools

import jax
import jax.numpy as jnp
from jax.experimental import pallas as pl
from jax.experimental.pallas import tpu as pltpu


def _mlp_kernel(x_ref, w_in_ref, b_in_ref,
                w_hid_ref, b_hid_ref,
                w_out_ref, b_out_ref,
                o_ref, *, n_hidden_layers):
    # x_ref:      (input_size, bt)  -- batch on lanes
    # w_in_ref:   (H, input_size)   -- normalization already folded in
    # b_in_ref:   (H, 1)
    # w_hid_ref:  (n_hid, H, H)     -- per-layer transposed weights
    # b_hid_ref:  (n_hid, H, 1)
    # w_out_ref:  (1, H)
    # b_out_ref:  (1, 1) scalar in SMEM
    # o_ref:      (1, bt)

    # Input layer + SiLU (activations stay (H, bt): lane-dense).
    h = jnp.dot(w_in_ref[...], x_ref[...], preferred_element_type=jnp.float32)
    h = h + b_in_ref[...]
    h = h * jax.nn.sigmoid(h)                                 # silu

    # Hidden layers (n_hid is small and static -> unrolled Python loop).
    for l in range(n_hidden_layers):
        h = jnp.dot(w_hid_ref[l], h, preferred_element_type=jnp.float32)
        h = h + b_hid_ref[l]
        h = h * jax.nn.sigmoid(h)                             # silu

    # Output layer: 6 * sigmoid(.), lane-dense (1, bt) store.
    out = jnp.dot(w_out_ref[...], h, preferred_element_type=jnp.float32)
    out = out + b_out_ref[0, 0]
    o_ref[...] = 6.0 * jax.nn.sigmoid(out)


def diff_cvar_ann_forward(x, params, env_params, *, batch_tile=512):
    """DiffCVaRANN forward pass as a single Pallas kernel, tiled over batch.

    x:       (B, input_size) f32
    params:  weights stored as (in_features, out_features) (transposed vs PyTorch)
    returns: (B, 1) f32
    """
    assert batch_tile % 128 == 0, "batch_tile must be a multiple of 128 (lane width)"
    B, input_size = x.shape
    assert input_size >= 3, "normalize_features expects at least 3 features"

    w_in, b_in = params["w_in"], params["b_in"]
    w_hid, b_hid = params["w_hid"], params["b_hid"]
    w_out, b_out = params["w_out"], params["b_out"]
    n_hid, H, _ = w_hid.shape

    # --- Fold feature normalization into the input layer (one-time, f32) ---
    # normalized = (x - shift) * scale
    scale = jnp.ones((input_size,), jnp.float32)
    scale = scale.at[0].set(1.0 / env_params["Ndt"])
    scale = scale.at[1].set(1.0 / 0.5)
    scale = scale.at[2].set(1.0 / env_params["max_q"])
    shift = jnp.zeros((input_size,), jnp.float32)
    shift = shift.at[1].set(env_params["theta"])

    w_in_folded = w_in * scale[:, None]                        # (in, H)
    b_in_folded = b_in - (shift * scale)[None, :] @ w_in       # (1, H)

    # --- Transpose so batch is the lane (last) axis everywhere ---
    w_in_t = w_in_folded.T                                     # (H, in)
    b_in_t = b_in_folded.T                                     # (H, 1)
    w_hid_t = jnp.transpose(w_hid, (0, 2, 1))                  # (n_hid, H, H)
    b_hid_t = b_hid[..., None]                                 # (n_hid, H, 1)
    w_out_t = w_out.T                                          # (1, H)
    b_out_s = jnp.reshape(b_out, (1, 1)).astype(jnp.float32)   # SMEM scalar

    # --- Lane-dense batch tiling: pad batch to a multiple of the tile ---
    bt = min(batch_tile, pl.cdiv(B, 128) * 128)                # multiple of 128
    Bp = pl.cdiv(B, bt) * bt
    x_t = jnp.pad(x.astype(jnp.float32).T, ((0, 0), (0, Bp - B)))  # (in, Bp)

    grid = (Bp // bt,)
    kernel = functools.partial(_mlp_kernel, n_hidden_layers=n_hid)

    out_t = pl.pallas_call(
        kernel,
        out_shape=jax.ShapeDtypeStruct((1, Bp), jnp.float32),
        grid_spec=pltpu.PrefetchScalarGridSpec(
            num_scalar_prefetch=0,
            grid=grid,
            in_specs=[
                pl.BlockSpec((input_size, bt), lambda i: (0, i)),      # x^T tile
                pl.BlockSpec((H, input_size), lambda i: (0, 0)),       # w_in^T (folded)
                pl.BlockSpec((H, 1), lambda i: (0, 0)),                # b_in^T (folded)
                pl.BlockSpec((n_hid, H, H), lambda i: (0, 0, 0)),      # w_hid^T
                pl.BlockSpec((n_hid, H, 1), lambda i: (0, 0, 0)),      # b_hid
                pl.BlockSpec((1, H), lambda i: (0, 0)),                # w_out^T
                pl.BlockSpec(memory_space=pltpu.MemorySpace.SMEM),     # b_out scalar
            ],
            out_specs=pl.BlockSpec((1, bt), lambda i: (0, i)),
        ),
        compiler_params=pltpu.CompilerParams(
            dimension_semantics=("parallel",)),
    )(x_t, w_in_t, b_in_t, w_hid_t, b_hid_t, w_out_t, b_out_s)

    return out_t[:, :B].T                                      # (B, 1)


def _reference_forward(x, params, env_params):
    """Pure-JAX reference for correctness checking (mirrors the PyTorch module)."""
    xn = x.at[:, 0].divide(env_params["Ndt"])
    xn = xn.at[:, 1].set((xn[:, 1] - env_params["theta"]) / 0.5)
    xn = xn.at[:, 2].divide(env_params["max_q"])
    h = jax.nn.silu(xn @ params["w_in"] + params["b_in"])
    for l in range(params["w_hid"].shape[0]):
        h = jax.nn.silu(h @ params["w_hid"][l] + params["b_hid"][l])
    return 6.0 * jax.nn.sigmoid(h @ params["w_out"] + params["b_out"])


def init_params(key, input_size, hidden_size, n_layers):
    """Deterministic synthetic parameters matching the PyTorch module's shapes.
    Weights stored as (in_features, out_features)."""
    n_hid = n_layers - 1
    keys = jax.random.split(key, 6)
    scale_in = 1.0 / jnp.sqrt(input_size)
    scale_h = 1.0 / jnp.sqrt(hidden_size)
    return {
        "w_in": jax.random.uniform(keys[0], (input_size, hidden_size),
                                   jnp.float32, -scale_in, scale_in),
        "b_in": jax.random.uniform(keys[1], (1, hidden_size),
                                   jnp.float32, -scale_in, scale_in),
        "w_hid": jax.random.uniform(keys[2], (n_hid, hidden_size, hidden_size),
                                    jnp.float32, -scale_h, scale_h),
        "b_hid": jax.random.uniform(keys[3], (n_hid, hidden_size),
                                    jnp.float32, -scale_h, scale_h),
        "w_out": jax.random.uniform(keys[4], (hidden_size, 1),
                                    jnp.float32, -scale_h, scale_h),
        "b_out": jax.random.uniform(keys[5], (1, 1),
                                    jnp.float32, -scale_h, scale_h),
    }


if __name__ == "__main__":
    key = jax.random.PRNGKey(0)

    # Module hyperparameters (small, consistent with the forward pass):
    input_size = 3        # (time, price, inventory) — normalize_features expects 3 features
    hidden_size = 32
    n_layers = 3          # -> 2 hidden layers after layer_in
    batch = 16

    env_params = {"Ndt": 10.0, "theta": 1.0, "max_q": 5.0}

    k_params, k_x = jax.random.split(key)
    params = init_params(k_params, input_size, hidden_size, n_layers)
    x = jax.random.normal(k_x, (batch, input_size), jnp.float32)

    out = diff_cvar_ann_forward(x, params, env_params)
    out = jax.block_until_ready(out)

    ref = _reference_forward(x, params, env_params)
    assert out.shape == (batch, 1)
    assert jnp.allclose(out, ref, atol=2e-5, rtol=1e-5), "mismatch vs reference"

    print("KERNEL_OK")
</pallas_src>

<mosaic_0001>
module attributes {stable_mosaic.version = 11 : i64} {
  func.func @_mlp_kernel(%arg0: i32, %arg1: memref<3x128xf32, #tpu.memory_space<vmem>>, %arg2: memref<32x3xf32, #tpu.memory_space<vmem>>, %arg3: memref<32x1xf32, #tpu.memory_space<vmem>>, %arg4: memref<2x32x32xf32, #tpu.memory_space<vmem>>, %arg5: memref<2x32x1xf32, #tpu.memory_space<vmem>>, %arg6: memref<1x32xf32, #tpu.memory_space<vmem>>, %arg7: memref<1x1xf32, #tpu.memory_space<smem>>, %arg8: memref<1x128xf32, #tpu.memory_space<vmem>>) attributes {dimension_semantics = [#tpu.dimension_semantics<parallel>], iteration_bounds = array<i64: 1>, scalar_prefetch = 0 : i64, scratch_operands = 0 : i64, tpu.core_type = #tpu.core_type<tc>, window_params = [{transform_indices = @transform_0, window_bounds = array<i64: 3, 128>}, {pipeline_mode = #tpu.pipeline_mode<synchronous>, transform_indices = @transform_1, window_bounds = array<i64: 32, 3>}, {pipeline_mode = #tpu.pipeline_mode<synchronous>, transform_indices = @transform_2, window_bounds = array<i64: 32, 1>}, {pipeline_mode = #tpu.pipeline_mode<synchronous>, transform_indices = @transform_3, window_bounds = array<i64: 2, 32, 32>}, {pipeline_mode = #tpu.pipeline_mode<synchronous>, transform_indices = @transform_4, window_bounds = array<i64: 2, 32, 1>}, {pipeline_mode = #tpu.pipeline_mode<synchronous>, transform_indices = @transform_5, window_bounds = array<i64: 1, 32>}, {transform_indices = @transform_6, window_bounds = array<i64: 1, 1>}, {transform_indices = @transform_7, window_bounds = array<i64: 1, 128>}]} {
    %c0 = arith.constant 0 : index
    %c0_0 = arith.constant 0 : index
    %0 = vector.load %arg2[%c0, %c0_0] : memref<32x3xf32, #tpu.memory_space<vmem>>, vector<32x3xf32>
    %c0_1 = arith.constant 0 : index
    %c0_2 = arith.constant 0 : index
    %1 = vector.load %arg1[%c0_1, %c0_2] : memref<3x128xf32, #tpu.memory_space<vmem>>, vector<3x128xf32>
    %cst = arith.constant dense<0.000000e+00> : vector<32x128xf32>
    %2 = tpu.matmul %0, %1, %cst {dimension_numbers = #tpu.dot_dimension_numbers<[1], [0], [0], [1], [0, 0, 1, 1], [], []>} : vector<32x3xf32>, vector<3x128xf32>, vector<32x128xf32> -> vector<32x128xf32>
    %c0_3 = arith.constant 0 : index
    %c0_4 = arith.constant 0 : index
    %3 = vector.load %arg3[%c0_3, %c0_4] : memref<32x1xf32, #tpu.memory_space<vmem>>, vector<32x1xf32>
    %4 = vector.broadcast %3 : vector<32x1xf32> to vector<32x128xf32>
    %5 = arith.addf %2, %4 : vector<32x128xf32>
    %6 = arith.negf %5 : vector<32x128xf32>
    %7 = math.exp %6 : vector<32x128xf32>
    %cst_5 = arith.constant 1.000000e+00 : f32
    %8 = vector.broadcast %cst_5 : f32 to vector<32x128xf32>
    %9 = arith.addf %8, %7 : vector<32x128xf32>
    %10 = arith.divf %8, %9 : vector<32x128xf32>
    %11 = arith.mulf %5, %10 : vector<32x128xf32>
    %c0_6 = arith.constant 0 : index
    %c0_7 = arith.constant 0 : index
    %c0_8 = arith.constant 0 : index
    %12 = vector.load %arg4[%c0_6, %c0_7, %c0_8] : memref<2x32x32xf32, #tpu.memory_space<vmem>>, vector<1x32x32xf32>
    %13 = vector.shape_cast %12 : vector<1x32x32xf32> to vector<32x32xf32>
    %cst_9 = arith.constant dense<0.000000e+00> : vector<32x128xf32>
    %14 = tpu.matmul %13, %11, %cst_9 {dimension_numbers = #tpu.dot_dimension_numbers<[1], [0], [0], [1], [0, 0, 1, 1], [], []>} : vector<32x32xf32>, vector<32x128xf32>, vector<32x128xf32> -> vector<32x128xf32>
    %c0_10 = arith.constant 0 : index
    %c0_11 = arith.constant 0 : index
    %c0_12 = arith.constant 0 : index
    %15 = vector.load %arg5[%c0_10, %c0_11, %c0_12] : memref<2x32x1xf32, #tpu.memory_space<vmem>>, vector<1x32x1xf32>
    %16 = vector.shape_cast %15 : vector<1x32x1xf32> to vector<32x1xf32>
    %17 = vector.broadcast %16 : vector<32x1xf32> to vector<32x128xf32>
    %18 = arith.addf %14, %17 : vector<32x128xf32>
    %19 = arith.negf %18 : vector<32x128xf32>
    %20 = math.exp %19 : vector<32x128xf32>
    %cst_13 = arith.constant 1.000000e+00 : f32
    %21 = vector.broadcast %cst_13 : f32 to vector<32x128xf32>
    %22 = arith.addf %21, %20 : vector<32x128xf32>
    %23 = arith.divf %21, %22 : vector<32x128xf32>
    %24 = arith.mulf %18, %23 : vector<32x128xf32>
    %c1 = arith.constant 1 : index
    %c0_14 = arith.constant 0 : index
    %c0_15 = arith.constant 0 : index
    %25 = vector.load %arg4[%c1, %c0_14, %c0_15] : memref<2x32x32xf32, #tpu.memory_space<vmem>>, vector<1x32x32xf32>
    %26 = vector.shape_cast %25 : vector<1x32x32xf32> to vector<32x32xf32>
    %cst_16 = arith.constant dense<0.000000e+00> : vector<32x128xf32>
    %27 = tpu.matmul %26, %24, %cst_16 {dimension_numbers = #tpu.dot_dimension_numbers<[1], [0], [0], [1], [0, 0, 1, 1], [], []>} : vector<32x32xf32>, vector<32x128xf32>, vector<32x128xf32> -> vector<32x128xf32>
    %c1_17 = arith.constant 1 : index
    %c0_18 = arith.constant 0 : index
    %c0_19 = arith.constant 0 : index
    %28 = vector.load %arg5[%c1_17, %c0_18, %c0_19] : memref<2x32x1xf32, #tpu.memory_space<vmem>>, vector<1x32x1xf32>
    %29 = vector.shape_cast %28 : vector<1x32x1xf32> to vector<32x1xf32>
    %30 = vector.broadcast %29 : vector<32x1xf32> to vector<32x128xf32>
    %31 = arith.addf %27, %30 : vector<32x128xf32>
    %32 = arith.negf %31 : vector<32x128xf32>
    %33 = math.exp %32 : vector<32x128xf32>
    %cst_20 = arith.constant 1.000000e+00 : f32
    %34 = vector.broadcast %cst_20 : f32 to vector<32x128xf32>
    %35 = arith.addf %34, %33 : vector<32x128xf32>
    %36 = arith.divf %34, %35 : vector<32x128xf32>
    %37 = arith.mulf %31, %36 : vector<32x128xf32>
    %c0_21 = arith.constant 0 : index
    %c0_22 = arith.constant 0 : index
    %38 = vector.load %arg6[%c0_21, %c0_22] : memref<1x32xf32, #tpu.memory_space<vmem>>, vector<1x32xf32>
    %cst_23 = arith.constant dense<0.000000e+00> : vector<1x128xf32>
    %39 = tpu.matmul %38, %37, %cst_23 {dimension_numbers = #tpu.dot_dimension_numbers<[1], [0], [0], [1], [0, 0, 1, 1], [], []>} : vector<1x32xf32>, vector<32x128xf32>, vector<1x128xf32> -> vector<1x128xf32>
    %c0_24 = arith.constant 0 : index
    %c0_25 = arith.constant 0 : index
    %40 = memref.load %arg7[%c0_24, %c0_25] : memref<1x1xf32, #tpu.memory_space<smem>>
    %41 = vector.broadcast %40 : f32 to vector<1x128xf32>
    %42 = arith.addf %39, %41 : vector<1x128xf32>
    %43 = arith.negf %42 : vector<1x128xf32>
    %44 = math.exp %43 : vector<1x128xf32>
    %cst_26 = arith.constant 1.000000e+00 : f32
    %45 = vector.broadcast %cst_26 : f32 to vector<1x128xf32>
    %46 = arith.addf %45, %44 : vector<1x128xf32>
    %47 = arith.divf %45, %46 : vector<1x128xf32>
    %cst_27 = arith.constant 6.000000e+00 : f32
    %48 = vector.broadcast %cst_27 : f32 to vector<1x128xf32>
    %49 = arith.mulf %48, %47 : vector<1x128xf32>
    %c0_28 = arith.constant 0 : index
    %c0_29 = arith.constant 0 : index
    %50 = vector.load %arg8[%c0_28, %c0_29] : memref<1x128xf32, #tpu.memory_space<vmem>>, vector<1x128xf32>
    tpu.vector_store %arg8[%c0_28, %c0_29], %49 {strides = array<i32>} : memref<1x128xf32, #tpu.memory_space<vmem>>, vector<1x128xf32>,
    return
  }
  func.func @transform_0(%arg0: i32) -> (i32, i32) {
    %c0_i32 = arith.constant 0 : i32
    %c0_i32_0 = arith.constant 0 : i32
    return %c0_i32, %arg0 : i32, i32
  }
  func.func @transform_1(%arg0: i32) -> (i32, i32) {
    %c0_i32 = arith.constant 0 : i32
    %c0_i32_0 = arith.constant 0 : i32
    %c0_i32_1 = arith.constant 0 : i32
    return %c0_i32, %c0_i32_0 : i32, i32
  }
  func.func @transform_2(%arg0: i32) -> (i32, i32) {
    %c0_i32 = arith.constant 0 : i32
    %c0_i32_0 = arith.constant 0 : i32
    %c0_i32_1 = arith.constant 0 : i32
    return %c0_i32, %c0_i32_0 : i32, i32
  }
  func.func @transform_3(%arg0: i32) -> (i32, i32, i32) {
    %c0_i32 = arith.constant 0 : i32
    %c0_i32_0 = arith.constant 0 : i32
    %c0_i32_1 = arith.constant 0 : i32
    %c0_i32_2 = arith.constant 0 : i32
    return %c0_i32, %c0_i32_0, %c0_i32_1 : i32, i32, i32
  }
  func.func @transform_4(%arg0: i32) -> (i32, i32, i32) {
    %c0_i32 = arith.constant 0 : i32
    %c0_i32_0 = arith.constant 0 : i32
    %c0_i32_1 = arith.constant 0 : i32
    %c0_i32_2 = arith.constant 0 : i32
    return %c0_i32, %c0_i32_0, %c0_i32_1 : i32, i32, i32
  }
  func.func @transform_5(%arg0: i32) -> (i32, i32) {
    %c0_i32 = arith.constant 0 : i32
    %c0_i32_0 = arith.constant 0 : i32
    %c0_i32_1 = arith.constant 0 : i32
    return %c0_i32, %c0_i32_0 : i32, i32
  }
  func.func @transform_6(%arg0: i32) -> (i32, i32) {
    %c0_i32 = arith.constant 0 : i32
    %c0_i32_0 = arith.constant 0 : i32
    %c0_i32_1 = arith.constant 0 : i32
    return %c0_i32, %c0_i32_0 : i32, i32
  }
  func.func @transform_7(%arg0: i32) -> (i32, i32) {
    %c0_i32 = arith.constant 0 : i32
    %c0_i32_0 = arith.constant 0 : i32
    return %c0_i32, %arg0 : i32, i32
  }
}

</mosaic_0001>

<bundles_post_ra>
// kernel: tpu_custom_call.1
= control target key start
LH: loop header
LB: loop body
LE: loop exit
PB: predicated region body
PF: predicated region fallthrough
CT: control target
= control target key end

     0   :  { %vm70_vm0 = vcmask 1042432   ;;  %vm57_vm1 = vcmask 23552   ;;  %v807_v5 = vmov 0   ;;  %s958_s0 = inlined_call_operand.vmem [shape: f32[3,128], index: 0, kind: input, shape index: {}]   ;;  %s959_s1 = inlined_call_operand.vmem [shape: f32[32,3], index: 1, kind: input, shape index: {}]   ;;  %s960_s2 = inlined_call_operand.vmem [shape: f32[32,1], index: 2, kind: input, shape index: {}]   ;;  %s961_s3 = inlined_call_operand.vmem [shape: f32[2,32,32], index: 3, kind: input, shape index: {}]   ;;  %s962_s4 = inlined_call_operand.vmem [shape: f32[2,32,1], index: 4, kind: input, shape index: {}]   ;;  %s963_s5 = inlined_call_operand.vmem [shape: f32[1,32], index: 5, kind: input, shape index: {}]   ;;  %s964_s6 = inlined_call_operand.<no memory space> [shape: f32[1,1], index: 6, kind: input, shape index: {}]   ;;  %s965_s7 = inlined_call_operand.hbm [shape: f32[1,128], index: 7, kind: output, shape index: {}]  }
   0x1   :  { %v32_v0 = vld [vmem:[%s958_s0] sm:$0x7]  ;;  %v29_v2 = vld [vmem:[%s959_s1 + $0x8] sm:$0xff]  ;;  %v30_v3 = vld [vmem:[%s959_s1 + $0x10] sm:$0xff]  ;;  %729 = vset.pattern.permute.xlu0 %v807_v5  ;;  %730 = vset.pattern.permute.xlu1 %v807_v5 }
   0x2   :  { %v28_v1 = vld [vmem:[%s959_s1] sm:$0xff]  ;;  %655 = vmatprep.subr.msk.mxu0 %vm70_vm0, %v32_v0  ;;  %v35_v6 = vld [vmem:[%s960_s2 + $0x10] sm:$0xff]  ;;  %v31_v7 = vld [vmem:[%s959_s1 + $0x18] sm:$0xff] }
   0x3   :  { %657 = vmatprep.mubr.msk.f32.mxu0 %vm57_vm1, %v28_v1  ;;  %v33_v4 = vld [vmem:[%s960_s2] sm:$0xff]  ;;  %656 = vmatpush3.msk.msra.mxu0 %vm70_vm0, %v32_v0  ;;  %v34_v8 = vld [vmem:[%s960_s2 + $0x8] sm:$0xff] }
   0x4   :  { %658 = vmatmul.mubr.msk.f32.vlgmr.msra.gmra.mrb[0].mxu0 %vm57_vm1, %v29_v2  ;;  %39 = vperm.xlu0 %729, %v33_v4  }
   0x5   :  { %660 = vmatprep.mubr.msk.f32.mxu0 %vm57_vm1, %v30_v3  ;;  %49 = vperm.xlu1 %730, %v35_v6  }
   0x6   :  { %13 = vsyncpa [#allocation4], 0  ;;  %v36_v9 = vld [vmem:[%s960_s2 + $0x18] sm:$0xff]  ;;  %v191_v10 = vld [vmem:[%s962_s4] sm:$0xff]  ;;  %vm215_vm2 = vcmask 261120   ;;  %vm809_vm3 = vmmov 0  }
   0x7   :  { %v192_v11 = vld [vmem:[%s962_s4 + $0x8] sm:$0xff]  ;;  %v193_v12 = vld [vmem:[%s962_s4 + $0x10] sm:$0xff]  ;;  %v194_v13 = vld [vmem:[%s962_s4 + $0x18] sm:$0xff]  ;;  %s811_s24 = smov [#allocation3]  }
   0x8   :  { %661 = vmatmul.mubr.msk.f32.gmra.mrb[2].mxu0 %vm57_vm1, %v31_v7  ;;  %44 = vperm.xlu0 %729, %v34_v8   ;;  %v615_v14 = vld [vmem:[%s962_s4 + $0x20] sm:$0xff]  ;;  %v616_v15 = vld [vmem:[%s962_s4 + $0x28] sm:$0xff]  ;;  %v617_v16 = vld [vmem:[%s962_s4 + $0x30] sm:$0xff]  ;;  %s586_s25 = sshll.u32 %s811_s24, 4  ;;  %s587_s25 = int_to_ptr.vmem [resolvable:$true] %s586_s25 }
   0x9   :  { %54 = vperm.xlu1 %730, %v36_v9   ;;  %v618_v17 = vld [vmem:[%s962_s4 + $0x38] sm:$0xff]  ;;  %v187_v18 = vld [vmem:[%s961_s3] sm:$0xff]  ;;  %v188_v53 = vld [vmem:[%s961_s3 + $0x8] sm:$0xff]  ;;  %s787_s26 = scalar_lea.vmem %s587_s25, 32  ;;  %p788_p1 = scmp.lt.s32.totalorder %s587_s25, %s587_s25 }
   0xa   :  { %671 = vmatprep.mubr.msk.f32.mxu1 %vm215_vm2, %v187_v18  ;;  %v189_v54 = vld [vmem:[%s961_s3 + $0x10] sm:$0xff]  ;;  %v190_v55 = vld [vmem:[%s961_s3 + $0x18] sm:$0xff]  ;;  %v611_v56 = vld [vmem:[%s961_s3 + $0x20] sm:$0xff] }
   0xb   :  { %685 = vmatprep.mubr.msk.f32.mxu0 %vm215_vm2, %v611_v56 }
   0xc   :  { %197 = vperm.xlu0 %729, %v191_v10  }
   0xd   :  { %202 = vperm.xlu1 %730, %v192_v11  }
  0x10   :  { %207 = vperm.xlu0 %729, %v193_v12  }
  0x11   :  { %212 = vperm.xlu1 %730, %v194_v13  }
  0x14   :  { %353 = vperm.xlu0 %729, %v615_v14  }
  0x15   :  { %358 = vperm.xlu1 %730, %v616_v15  }
  0x18   :  { %363 = vperm.xlu0 %729, %v617_v16  }
  0x19   :  { %368 = vperm.xlu1 %730, %v618_v17  }
  0x83   :  { %v40_v19 = vpop.permute.xlu0 %39 }
  0x84   :  { %v50_v20 = vpop.permute.xlu1 %49 }
  0x87   :  { %v45_v21 = vpop.permute.xlu0 %44 }
  0x88   :  { %v55_v27 = vpop.permute.xlu1 %54 }
  0x8b   :  { %v198_v58 = vpop.permute.xlu0 %197 }
  0x8c   :  { %v203_v57 = vpop.permute.xlu1 %202 }
  0x8f   :  { %v208_v3 = vpop.permute.xlu0 %207 }
  0x90   :  { %v213_v0 = vpop.permute.xlu1 %212 }
  0xd7   :  { %v659_v22 = vpop.f32.mrb[0].mxu0 }
  0xd8   :  { %v146_v23 = vadd.f32 %v659_v22, %v45_v21  ;;  %v140_v24 = vpop.f32.mrb[1].mxu0 }
  0xd9   :  { %v141_v25 = vadd.f32 %v140_v24, %v40_v19 }
  0xda   :  { %v600_v26 = vmul.f32 -1.442695, %v146_v23 }
  0xdb   :  { %v599_v28 = vmul.f32 -1.442695, %v141_v25  ;;  %v662_v29 = vpop.f32.mrb[2].mxu0 }
  0xdc   :  { %731 = vpow2.f32 %v600_v26  ;;  %v156_v30 = vadd.f32 %v662_v29, %v55_v27  ;;  %v150_v31 = vpop.f32.mrb[3].mxu0  ;;  %v612_v27 = vld [vmem:[%s961_s3 + $0x28] sm:$0xff]  ;;  %v614_v29 = vld [vmem:[%s961_s3 + $0x38] sm:$0xff] }
  0xdd   :  { %733 = vpow2.f32 %v599_v28  ;;  %v151_v32 = vadd.f32 %v150_v31, %v50_v20  ;;  %v613_v28 = vld [vmem:[%s961_s3 + $0x30] sm:$0xff]  ;;  %v810_v31 = vmov 0.0  }
  0xde   :  { %v602_v33 = vmul.f32 -1.442695, %v156_v30 }
  0xdf   :  { %v601_v34 = vmul.f32 -1.442695, %v151_v32 }
  0xe0   :  { %735 = vpow2.f32 %v602_v33  ;;  %v354_v33 = vpop.permute.xlu0 %353 }
  0xe1   :  { %737 = vpow2.f32 %v601_v34 }
  0xe6   :  { %v732_v35 = vpop.eup %731 }
  0xe7   :  { %v734_v36 = vpop.eup %733  ;;  %v172_v37 = vadd.f32 1.0, %v732_v35 }
  0xe8   :  { %v171_v38 = vadd.f32 1.0, %v734_v36 }
  0xe9   :  { %739 = vrcp.f32 %v172_v37 }
  0xea   :  { %v736_v39 = vpop.eup %735  ;;  %741 = vrcp.f32 %v171_v38 }
  0xeb   :  { %v738_v40 = vpop.eup %737  ;;  %v174_v41 = vadd.f32 1.0, %v736_v39 }
  0xec   :  { %v173_v42 = vadd.f32 1.0, %v738_v40 }
  0xed   :  { %743 = vrcp.f32 %v174_v41 }
  0xee   :  { %745 = vrcp.f32 %v173_v42  ;;  %v364_v42 = vpop.permute.xlu0 %363 }
  0xf3   :  { %v740_v43 = vpop.eup %739 }
  0xf4   :  { %v742_v44 = vpop.eup %741  ;;  %v184_v45 = vmul.f32 %v740_v43, %v146_v23 }
  0xf5   :  { %v183_v46 = vmul.f32 %v742_v44, %v141_v25 }
  0xf7   :  { %v744_v47 = vpop.eup %743  ;;  %v702_v48 = vpack.c.bf16 %v184_v45, %v183_v46 }
  0xf8   :  { %v746_v49 = vpop.eup %745  ;;  %v186_v50 = vmul.f32 %v744_v47, %v156_v30  ;;  %v808_v30 = vmov 0.0|0.0  }
  0xf9   :  { %v185_v51 = vmul.f32 %v746_v49, %v151_v32  ;;  %703 = vmatprep.subr.bf16.mxu1 %v702_v48  ;;  %v359_v32 = vpop.permute.xlu1 %358 }
  0xfa   :  { %705 = vmatpush3.bf16.msra.mxu1 %v702_v48 }
  0xfb   :  { %v706_v52 = vpack.c.bf16 %v186_v50, %v185_v51 }
  0xfd   :  { %707 = vmatprep.subr.bf16.mxu1 %v706_v52  ;;  %v369_v39 = vpop.permute.xlu1 %368 }
  0xfe   :  { %709 = vmatpush3.bf16.msra.mxu1 %v706_v52 }
  0xff   :  { %718 = vmatprep.subr.bf16.mxu1 %v808_v30 }
 0x101   :  { %672 = vmatmul.mubr.msk.f32.vlgmr.msra.gmra.mrb[0].mxu1 %vm215_vm2, %v188_v53 }
 0x102   :  { %674 = vmatprep.mubr.msk.f32.mxu1 %vm215_vm2, %v189_v54 }
 0x105   :  { %675 = vmatmul.mubr.msk.f32.gmra.mrb[2].mxu1 %vm215_vm2, %v190_v55 }
 0x106   :  { %699 = vmatprep.mubr.msk.f32.mxu1 %vm809_vm3, %v810_v31 }
 0x1d4   :  { %v673_v59 = vpop.f32.mrb[0].mxu1 }
 0x1d5   :  { %v300_v60 = vadd.f32 %v673_v59, %v203_v57  ;;  %v294_v61 = vpop.f32.mrb[1].mxu1 }
 0x1d6   :  { %v295_v62 = vadd.f32 %v294_v61, %v198_v58 }
 0x1d7   :  { %v608_v63 = vmul.f32 -1.442695, %v300_v60 }
 0x1d8   :  { %v607_v1 = vmul.f32 -1.442695, %v295_v62  ;;  %v676_v2 = vpop.f32.mrb[2].mxu1 }
 0x1d9   :  { %747 = vpow2.f32 %v608_v63  ;;  %v310_v4 = vadd.f32 %v676_v2, %v213_v0  ;;  %v304_v5 = vpop.f32.mrb[3].mxu1  ;;  %v496_v2 = vld [vmem:[%s963_s5] sm:$0x1]  ;;  %s783_s5 = scalar_lea.vmem %s587_s25, 16 }
 0x1da   :  { %749 = vpow2.f32 %v607_v1  ;;  %v305_v6 = vadd.f32 %v304_v5, %v208_v3  ;;  %v498_v3 = vstv %s964_s6  ;;  %p784_p0 = scmp.ne.s32.totalorder %s587_s25, %s783_s5  ;;  %p789_p2 = scmp.lt.s32.totalorder %s787_s26, %s783_s5 }
 0x1db   :  { %v610_v7 = vmul.f32 -1.442695, %v310_v4 }
 0x1dc   :  { %v609_v8 = vmul.f32 -1.442695, %v305_v6  ;;  %p790_p3 = por %p789_p2, %p788_p1 }
 0x1dd   :  { %751 = vpow2.f32 %v610_v7 }
 0x1de   :  { %753 = vpow2.f32 %v609_v8  ;;  %p791_p4 = pnand %p790_p3, %p784_p0 }
 0x1e3   :  { %v748_v9 = vpop.eup %747 }
 0x1e4   :  { %v750_v10 = vpop.eup %749  ;;  %v326_v11 = vadd.f32 1.0, %v748_v9 }
 0x1e5   :  { %v325_v12 = vadd.f32 1.0, %v750_v10 }
 0x1e6   :  { %755 = vrcp.f32 %v326_v11 }
 0x1e7   :  { %v752_v13 = vpop.eup %751  ;;  %757 = vrcp.f32 %v325_v12 }
 0x1e8   :  { %v754_v14 = vpop.eup %753  ;;  %v328_v15 = vadd.f32 1.0, %v752_v13 }
 0x1e9   :  { %v327_v16 = vadd.f32 1.0, %v754_v14 }
 0x1ea   :  { %759 = vrcp.f32 %v328_v15 }
 0x1eb   :  { %761 = vrcp.f32 %v327_v16 }
 0x1f0   :  { %v756_v17 = vpop.eup %755 }
 0x1f1   :  { %v758_v18 = vpop.eup %757  ;;  %v338_v19 = vmul.f32 %v756_v17, %v300_v60 }
 0x1f2   :  { %v337_v20 = vmul.f32 %v758_v18, %v295_v62 }
 0x1f4   :  { %v760_v21 = vpop.eup %759  ;;  %v710_v22 = vpack.c.bf16 %v338_v19, %v337_v20 }
 0x1f5   :  { %v762_v23 = vpop.eup %761  ;;  %v340_v24 = vmul.f32 %v760_v21, %v310_v4 }
 0x1f6   :  { %v339_v25 = vmul.f32 %v762_v23, %v305_v6  ;;  %711 = vmatprep.subr.bf16.mxu0 %v710_v22 }
 0x1f7   :  { %713 = vmatpush3.bf16.msra.mxu0 %v710_v22 }
 0x1f8   :  { %v714_v26 = vpack.c.bf16 %v340_v24, %v339_v25 }
 0x1fa   :  { %715 = vmatprep.subr.bf16.mxu0 %v714_v26 }
 0x1fb   :  { %717 = vmatpush3.bf16.msra.mxu0 %v714_v26 }
 0x1fe   :  { %686 = vmatmul.mubr.msk.f32.vlgmr.msra.gmra.mrb[4].mxu0 %vm215_vm2, %v612_v27 }
 0x1ff   :  { %688 = vmatprep.mubr.msk.f32.mxu0 %vm215_vm2, %v613_v28 }
 0x202   :  { %689 = vmatmul.mubr.msk.f32.gmra.mrb[6].mxu0 %vm215_vm2, %v614_v29 }
 0x2d1   :  { %v687_v34 = vpop.f32.mrb[4].mxu0 }
 0x2d2   :  { %v455_v35 = vadd.f32 %v687_v34, %v359_v32  ;;  %v449_v36 = vpop.f32.mrb[5].mxu0 }
 0x2d3   :  { %v450_v37 = vadd.f32 %v449_v36, %v354_v33 }
 0x2d4   :  { %v624_v38 = vmul.f32 -1.442695, %v455_v35 }
 0x2d5   :  { %v623_v40 = vmul.f32 -1.442695, %v450_v37  ;;  %v690_v41 = vpop.f32.mrb[6].mxu0 }
 0x2d6   :  { %763 = vpow2.f32 %v624_v38  ;;  %v465_v43 = vadd.f32 %v690_v41, %v369_v39  ;;  %v459_v44 = vpop.f32.mrb[7].mxu0 }
 0x2d7   :  { %765 = vpow2.f32 %v623_v40  ;;  %v460_v45 = vadd.f32 %v459_v44, %v364_v42 }
 0x2d8   :  { %v626_v46 = vmul.f32 -1.442695, %v465_v43 }
 0x2d9   :  { %v625_v47 = vmul.f32 -1.442695, %v460_v45 }
 0x2da   :  { %767 = vpow2.f32 %v626_v46 }
 0x2db   :  { %769 = vpow2.f32 %v625_v47 }
 0x2e0   :  { %v764_v48 = vpop.eup %763 }
 0x2e1   :  { %v766_v49 = vpop.eup %765  ;;  %v481_v50 = vadd.f32 1.0, %v764_v48 }
 0x2e2   :  { %v480_v51 = vadd.f32 1.0, %v766_v49 }
 0x2e3   :  { %771 = vrcp.f32 %v481_v50 }
 0x2e4   :  { %v768_v52 = vpop.eup %767  ;;  %773 = vrcp.f32 %v480_v51 }
 0x2e5   :  { %v770_v53 = vpop.eup %769  ;;  %v483_v54 = vadd.f32 1.0, %v768_v52 }
 0x2e6   :  { %v482_v55 = vadd.f32 1.0, %v770_v53 }
 0x2e7   :  { %775 = vrcp.f32 %v483_v54 }
 0x2e8   :  { %777 = vrcp.f32 %v482_v55 }
 0x2ed   :  { %v772_v56 = vpop.eup %771 }
 0x2ee   :  { %v774_v57 = vpop.eup %773  ;;  %v493_v58 = vmul.f32 %v772_v56, %v455_v35 }
 0x2ef   :  { %v492_v59 = vmul.f32 %v774_v57, %v450_v37 }
 0x2f1   :  { %v776_v60 = vpop.eup %775  ;;  %v719_v61 = vpack.c.bf16 %v493_v58, %v492_v59 }
 0x2f2   :  { %v778_v62 = vpop.eup %777  ;;  %v495_v63 = vmul.f32 %v776_v60, %v465_v43 }
 0x2f3   :  { %v494_v0 = vmul.f32 %v778_v62, %v460_v45  ;;  %720 = vmatpush3.bf16.msra.mxu1 %v719_v61 }
 0x2f4   :  { %721 = vmatprep.subr.bf16.mxu1 %v808_v30 }
 0x2f5   :  { %v722_v1 = vpack.c.bf16 %v495_v63, %v494_v0 }
 0x2f7   :  { %723 = vmatpush3.bf16.msra.mxu1 %v722_v1 }
 0x2fa   :  { %700 = vmatmul.mubr.msk.f32.vlgmr.msra.gmra.mrb[4].mxu1 %vm215_vm2, %v496_v2 }
 0x3cd   :  { %v568_v4 = vpop.f32.mrb[4].mxu1 }
 0x3ce   :  { %v569_v5 = vadd.f32 %v568_v4, %v498_v3  ;;  %v701_v6 = vpop.f32.mrb[5].mxu1 }
 0x3d0   :  { %v628_v7 = vmul.f32 -1.442695, %v569_v5 }
 0x3d2   :  { %779 = vpow2.f32 %v628_v7 }
 0x3dc   :  { %v780_v8 = vpop.eup %779 }
 0x3dd   :  { %v575_v9 = vadd.f32 1.0, %v780_v8 }
 0x3df   :  { %781 = vrcp.f32 %v575_v9 }
 0x3e9   :  { %v782_v10 = vpop.eup %781 }
 0x3ea   :  { %v578_v11 = vmul.f32 6.0, %v782_v10 }
 0x3ec   :  { %579 = vst [vmem:[#allocation3] sm:$0x1] %v578_v11 }
 0x3ed   :  { %794 = shalt.err (!%p791_p4)
}
 0x3ee   :  { %s795_s28 = scalar_lea.hbm %s965_s7, 16 }
 0x3ef   :  { %p796_p5 = scmp.ne.s32.totalorder %s965_s7, %s795_s28  ;;  %p799_p6 = scmp.lt.u32.totalorder %s795_s28, %s965_s7 }
 0x3f1   :  { %p801_p7 = pnand %p799_p6, %p796_p5 }
 0x3f3   :  { %804 = shalt.err (!%p801_p7)
}
 0x3f4   :  { %589 = dma.vmem_to_hbm [thread:$0]  %s587_s25, 16, %s965_s7, [#allocation4]  }
 0x3f5   :  { %805 = dma.done.wait [#allocation4], 16  }
 0x3f6   :  { %806 = vsyncadd [#allocation4], 4294967280 }
 0x3f7   :  { %593 = vsyncpa [#allocation4], 1 }

</bundles_post_ra>
